<compile_context>
chip_gen: v5e
topology: v5e:2x2
jax: 0.10.0
libtpu: 0.0.40
codegen_flags: <defaults>
</compile_context>

<pallas_src>
import jax
import jax.numpy as jnp
from jax.experimental import pallas as pl
from jax.experimental.pallas import tpu as pltpu


def linear_kernel(x_ref, w_ref, b_ref, o_ref):
    """o = x @ W + b on the VPU, natural batch-major layout.

    x_ref : (TB, K) VMEM   -- batch tile, natural (batch-major) layout
    w_ref : (K*N,)  SMEM   -- row-major flatten of the (K, N) weight
    b_ref : (N,)    SMEM
    o_ref : (TB, N) VMEM
    """
    K = x_ref.shape[1]        # 4
    N = o_ref.shape[1]        # 2
    x = x_ref[...]            # single block load
    cols = []
    for n in range(N):                        # static unroll (N = 2)
        acc = x[:, 0:1] * w_ref[0 * N + n]
        for k in range(1, K):                 # static unroll (K = 4)
            acc = acc + x[:, k:k + 1] * w_ref[k * N + n]
        cols.append(acc + b_ref[n])
    o_ref[...] = jnp.concatenate(cols, axis=-1)   # single block store


def linear_pallas(x, w, b):
    """y = x @ w + b, then unsqueeze(1): (B, K) -> (B, 1, N)."""
    B, K = x.shape
    N = w.shape[1]

    # One grid step for small batches (fixed per-step cost dominates this tiny
    # op on single-TC chips).  For large, divisible batches use two "parallel"
    # tiles so both TensorCores on v7x get a tile (harmless on v5e/v6e).
    n_tiles = 2 if (B >= 256 and B % 16 == 0) else 1
    tb = B // n_tiles

    y = pl.pallas_call(
        linear_kernel,
        out_shape=jax.ShapeDtypeStruct((B, N), x.dtype),
        grid=(n_tiles,),
        in_specs=[
            pl.BlockSpec((tb, K), lambda i: (i, 0)),              # x batch tile
            pl.BlockSpec(memory_space=pltpu.MemorySpace.SMEM),    # 8 weight scalars
            pl.BlockSpec(memory_space=pltpu.MemorySpace.SMEM),    # 2 bias scalars
        ],
        out_specs=pl.BlockSpec((tb, N), lambda i: (i, 0)),
        compiler_params=pltpu.CompilerParams(
            dimension_semantics=("parallel",),
        ),
    )(x, w.reshape(-1), b)

    return y.reshape(B, 1, N)   # == torch.unsqueeze(., 1), metadata-only


def model_forward(x, w, b):
    return linear_pallas(x, w, b)


if __name__ == "__main__":
    key = jax.random.PRNGKey(0)
    kx, kw, kb = jax.random.split(key, 3)

    B, IN_F, OUT_F = 4, 4, 2
    # Input consistent with the forward pass: last dim must equal in_features=4.
    x = jax.random.normal(kx, (B, IN_F), dtype=jnp.float32)

    # nn.Linear(4, 2)-style init; PyTorch W is (out, in) -> we store W.T = (in, out).
    bound = 1.0 / jnp.sqrt(IN_F)
    w = jax.random.uniform(kw, (IN_F, OUT_F), dtype=jnp.float32,
                           minval=-bound, maxval=bound)
    b = jax.random.uniform(kb, (OUT_F,), dtype=jnp.float32,
                           minval=-bound, maxval=bound)

    out = jax.jit(model_forward)(x, w, b)
    jax.block_until_ready(out)

    # Reference check in plain JAX.
    ref = jnp.expand_dims(x @ w + b, axis=1)
    assert out.shape == (B, 1, OUT_F), out.shape
    assert jnp.allclose(out, ref, atol=1e-5, rtol=1e-5), float(jnp.max(jnp.abs(out - ref)))
    print("KERNEL_OK")
</pallas_src>

<mosaic_0001>
module attributes {stable_mosaic.version = 11 : i64} {
  func.func @linear_kernel(%arg0: i32, %arg1: memref<4x4xf32, #tpu.memory_space<vmem>>, %arg2: memref<8xf32, #tpu.memory_space<smem>>, %arg3: memref<2xf32, #tpu.memory_space<smem>>, %arg4: memref<4x2xf32, #tpu.memory_space<vmem>>) attributes {dimension_semantics = [#tpu.dimension_semantics<parallel>], iteration_bounds = array<i64: 1>, scalar_prefetch = 0 : i64, scratch_operands = 0 : i64, tpu.core_type = #tpu.core_type<tc>, window_params = [{transform_indices = @transform_0, window_bounds = array<i64: 4, 4>}, {transform_indices = @transform_1, window_bounds = array<i64: 8>}, {transform_indices = @transform_2, window_bounds = array<i64: 2>}, {transform_indices = @transform_3, window_bounds = array<i64: 4, 2>}]} {
    %c0 = arith.constant 0 : index
    %c0_0 = arith.constant 0 : index
    %0 = vector.load %arg1[%c0, %c0_0] : memref<4x4xf32, #tpu.memory_space<vmem>>, vector<4x4xf32>
    %1 = vector.extract_strided_slice %0 {offsets = [0, 0], sizes = [4, 1], strides = [1, 1]} : vector<4x4xf32> to vector<4x1xf32>
    %c0_1 = arith.constant 0 : index
    %2 = memref.load %arg2[%c0_1] : memref<8xf32, #tpu.memory_space<smem>>
    %3 = vector.broadcast %2 : f32 to vector<4x1xf32>
    %4 = arith.mulf %1, %3 : vector<4x1xf32>
    %5 = vector.extract_strided_slice %0 {offsets = [0, 1], sizes = [4, 1], strides = [1, 1]} : vector<4x4xf32> to vector<4x1xf32>
    %c2 = arith.constant 2 : index
    %6 = memref.load %arg2[%c2] : memref<8xf32, #tpu.memory_space<smem>>
    %7 = vector.broadcast %6 : f32 to vector<4x1xf32>
    %8 = arith.mulf %5, %7 : vector<4x1xf32>
    %9 = arith.addf %4, %8 : vector<4x1xf32>
    %10 = vector.extract_strided_slice %0 {offsets = [0, 2], sizes = [4, 1], strides = [1, 1]} : vector<4x4xf32> to vector<4x1xf32>
    %c4 = arith.constant 4 : index
    %11 = memref.load %arg2[%c4] : memref<8xf32, #tpu.memory_space<smem>>
    %12 = vector.broadcast %11 : f32 to vector<4x1xf32>
    %13 = arith.mulf %10, %12 : vector<4x1xf32>
    %14 = arith.addf %9, %13 : vector<4x1xf32>
    %15 = vector.extract_strided_slice %0 {offsets = [0, 3], sizes = [4, 1], strides = [1, 1]} : vector<4x4xf32> to vector<4x1xf32>
    %c6 = arith.constant 6 : index
    %16 = memref.load %arg2[%c6] : memref<8xf32, #tpu.memory_space<smem>>
    %17 = vector.broadcast %16 : f32 to vector<4x1xf32>
    %18 = arith.mulf %15, %17 : vector<4x1xf32>
    %19 = arith.addf %14, %18 : vector<4x1xf32>
    %c0_2 = arith.constant 0 : index
    %20 = memref.load %arg3[%c0_2] : memref<2xf32, #tpu.memory_space<smem>>
    %21 = vector.broadcast %20 : f32 to vector<4x1xf32>
    %22 = arith.addf %19, %21 : vector<4x1xf32>
    %23 = vector.extract_strided_slice %0 {offsets = [0, 0], sizes = [4, 1], strides = [1, 1]} : vector<4x4xf32> to vector<4x1xf32>
    %c1 = arith.constant 1 : index
    %24 = memref.load %arg2[%c1] : memref<8xf32, #tpu.memory_space<smem>>
    %25 = vector.broadcast %24 : f32 to vector<4x1xf32>
    %26 = arith.mulf %23, %25 : vector<4x1xf32>
    %27 = vector.extract_strided_slice %0 {offsets = [0, 1], sizes = [4, 1], strides = [1, 1]} : vector<4x4xf32> to vector<4x1xf32>
    %c3 = arith.constant 3 : index
    %28 = memref.load %arg2[%c3] : memref<8xf32, #tpu.memory_space<smem>>
    %29 = vector.broadcast %28 : f32 to vector<4x1xf32>
    %30 = arith.mulf %27, %29 : vector<4x1xf32>
    %31 = arith.addf %26, %30 : vector<4x1xf32>
    %32 = vector.extract_strided_slice %0 {offsets = [0, 2], sizes = [4, 1], strides = [1, 1]} : vector<4x4xf32> to vector<4x1xf32>
    %c5 = arith.constant 5 : index
    %33 = memref.load %arg2[%c5] : memref<8xf32, #tpu.memory_space<smem>>
    %34 = vector.broadcast %33 : f32 to vector<4x1xf32>
    %35 = arith.mulf %32, %34 : vector<4x1xf32>
    %36 = arith.addf %31, %35 : vector<4x1xf32>
    %37 = vector.extract_strided_slice %0 {offsets = [0, 3], sizes = [4, 1], strides = [1, 1]} : vector<4x4xf32> to vector<4x1xf32>
    %c7 = arith.constant 7 : index
    %38 = memref.load %arg2[%c7] : memref<8xf32, #tpu.memory_space<smem>>
    %39 = vector.broadcast %38 : f32 to vector<4x1xf32>
    %40 = arith.mulf %37, %39 : vector<4x1xf32>
    %41 = arith.addf %36, %40 : vector<4x1xf32>
    %c1_3 = arith.constant 1 : index
    %42 = memref.load %arg3[%c1_3] : memref<2xf32, #tpu.memory_space<smem>>
    %43 = vector.broadcast %42 : f32 to vector<4x1xf32>
    %44 = arith.addf %41, %43 : vector<4x1xf32>
    %45 = tpu.concatenate %22, %44 in 1 : vector<4x1xf32>, vector<4x1xf32> -> vector<4x2xf32>
    %c0_4 = arith.constant 0 : index
    %c0_5 = arith.constant 0 : index
    %46 = vector.load %arg4[%c0_4, %c0_5] : memref<4x2xf32, #tpu.memory_space<vmem>>, vector<4x2xf32>
    tpu.vector_store %arg4[%c0_4, %c0_5], %45 {strides = array<i32>} : memref<4x2xf32, #tpu.memory_space<vmem>>, vector<4x2xf32>,
    return
  }
  func.func @transform_0(%arg0: i32) -> (i32, i32) {
    %c0_i32 = arith.constant 0 : i32
    %c0_i32_0 = arith.constant 0 : i32
    return %arg0, %c0_i32 : i32, i32
  }
  func.func @transform_1(%arg0: i32) -> i32 {
    %c0_i32 = arith.constant 0 : i32
    %c0_i32_0 = arith.constant 0 : i32
    return %c0_i32 : i32
  }
  func.func @transform_2(%arg0: i32) -> i32 {
    %c0_i32 = arith.constant 0 : i32
    %c0_i32_0 = arith.constant 0 : i32
    return %c0_i32 : i32
  }
  func.func @transform_3(%arg0: i32) -> (i32, i32) {
    %c0_i32 = arith.constant 0 : i32
    %c0_i32_0 = arith.constant 0 : i32
    return %arg0, %c0_i32 : i32, i32
  }
}

</mosaic_0001>

<bundles_post_ra>
// kernel: model_forward.1
= control target key start
LH: loop header
LB: loop body
LE: loop exit
PB: predicated region body
PF: predicated region fallthrough
CT: control target
= control target key end

     0   :  { %8 = vsyncpa [#allocation3], 0  ;;  %s194_s0 = inlined_call_operand.vmem [shape: f32[4,4], index: 0, kind: input, shape index: {}]   ;;  %s195_s1 = inlined_call_operand.vmem [shape: f32[8], index: 1, kind: input, shape index: {}]   ;;  %s196_s2 = inlined_call_operand.vmem [shape: f32[2], index: 2, kind: input, shape index: {}]   ;;  %s197_s3 = inlined_call_operand.vmem [shape: f32[4,2], index: 3, kind: output, shape index: {}]  }
   0x1   :  { %s17_s14 = sshll.u32 %s195_s1, 4  ;;  %s18_s14 = int_to_ptr.vmem [resolvable:$true] %s17_s14 }
   0x2   :  { %9 = vsyncpa [#allocation5], 0  ;;  %s26_s17 = sshll.u32 %s196_s2, 4  ;;  %s156_s18 = smov [#allocation2]   ;;  %s27_s17 = int_to_ptr.vmem [resolvable:$true] %s26_s17 }
   0x3   :  { %20 = dma.vmem_to_smem %s18_s14, 16, %s156_s18, [#allocation3]  }
   0x4   :  { %s157_s19 = smov [#allocation4]  }
   0x5   :  { %29 = dma.vmem_to_smem %s27_s17, 16, %s157_s19, [#allocation5]  }
   0x6   :  { %152 = dma.done.wait [#allocation3], 16  }
   0x7   :  { %153 = vsyncadd [#allocation3], 4294967280 }
   0x8   :  { %154 = dma.done.wait [#allocation5], 16  }
   0x9   :  { %155 = vsyncadd [#allocation5], 4294967280 }
   0xa   :  { %38 = sfence }
   0xb   :  { %s118_s20 = sld [smem:[#allocation2 + $0x3]]  ;;  %v39_v0 = vld [vmem:[%s194_s0] sm:$0xf]  ;;  %s158_s2 = smov 127   ;;  %vm104_vm0 = vcmask 7168   ;;  %vm106_vm1 = vcmask 11264  }
   0xc   :  { %s119_s21 = sld [smem:[#allocation2 + $0x5]]  ;;  %s159_s24 = smov 125  }
   0xd   :  { %s120_s22 = sld [smem:[#allocation2 + $0x7]]  ;;  %s160_s25 = smov 126  }
   0xe   :  { %s114_s26 = sld [smem:[#allocation2 + $0x2]]  ;;  %s161_s30 = smov 1  }
   0xf   :  { %s115_s27 = sld [smem:[#allocation2 + $0x4]] }
  0x10   :  { %s116_s28 = sld [smem:[#allocation2 + $0x6]] }
  0x11   :  { %v74_v1 = vstv %s118_s20  ;;  %s117_s0 = sld [smem:[#allocation2 + $0x1]] }
  0x12   :  { %v75_v2 = vmul.f32 %v74_v1, %v39_v0  ;;  %v82_v5 = vstv %s119_s21  ;;  %s121_s29 = sld [smem:[#allocation4 + $0x1]] }
  0x13   :  { %v90_v3 = vstv %s120_s22  ;;  %v83_v6 = vmul.f32 %v82_v5, %v39_v0  ;;  %s40_s4 = sld [smem:[#allocation2]] }
  0x14   :  { %77 = vrot.lane.b32.xlu0 %v75_v2, %s158_s2  ;;  %v91_v4 = vmul.f32 %v90_v3, %v39_v0  ;;  %v44_v7 = vstv %s114_s26  ;;  %s67_s5 = sld [smem:[#allocation4]] }
  0x15   :  { %v45_v8 = vmul.f32 %v44_v7, %v39_v0  ;;  %v52_v9 = vstv %s115_s27 }
  0x16   :  { %93 = vrot.lane.b32.xlu1 %v91_v4, %s159_s24  ;;  %v53_v10 = vmul.f32 %v52_v9, %v39_v0  ;;  %v60_v11 = vstv %s116_s28 }
  0x17   :  { %v61_v12 = vmul.f32 %v60_v11, %v39_v0  ;;  %v71_v13 = vstv %s117_s0 }
  0x18   :  { %55 = vrot.lane.b32.xlu2 %v53_v10, %s160_s25  ;;  %v72_v15 = vmul.f32 %v71_v13, %v39_v0  ;;  %v98_v20 = vstv %s121_s29 }
  0x19   :  { %v41_v23 = vstv %s40_s4 }
  0x1a   :  { %v42_v25 = vmul.f32 %v41_v23, %v39_v0  ;;  %v68_v31 = vstv %s67_s5 }
  0x1c   :  { %85 = vrot.lane.b32.xlu0 %v83_v6, %s160_s25 }
  0x1e   :  { %47 = vrot.lane.b32.xlu1 %v45_v8, %s158_s2 }
  0x20   :  { %63 = vrot.lane.b32.xlu2 %v61_v12, %s159_s24 }
  0x72   :  { %v56_v24 = vpop.permute.xlu2 %55 }
  0x7a   :  { %v64_v29 = vpop.permute.xlu2 %63 }
  0x86   :  { %v78_v14 = vpop.permute.xlu0 %77 }
  0x87   :  { %v80_v16 = vadd.f32 %v78_v14, %v72_v15 }
  0x88   :  { %v94_v18 = vpop.permute.xlu1 %93 }
  0x8e   :  { %v86_v17 = vpop.permute.xlu0 %85 }
  0x8f   :  { %v88_v19 = vadd.f32 %v86_v17, %v80_v16 }
  0x90   :  { %v48_v26 = vpop.permute.xlu1 %47 }
  0x91   :  { %v96_v21 = vadd.f32 %v94_v18, %v88_v19  ;;  %v50_v27 = vadd.f32 %v48_v26, %v42_v25 }
  0x93   :  { %v99_v22 = vadd.f32 %v98_v20, %v96_v21  ;;  %v58_v28 = vadd.f32 %v56_v24, %v50_v27 }
  0x95   :  { %101 = vrot.lane.b32.xlu0 %v99_v22, %s161_s30  ;;  %v66_v30 = vadd.f32 %v64_v29, %v58_v28 }
  0x97   :  { %v69_v32 = vadd.f32 %v68_v31, %v66_v30 }
 0x107   :  { %v102_v33 = vpop.permute.xlu0 %101 }
 0x108   :  { %v105_v34 = vsel %vm104_vm0, %v69_v32, %v102_v33 }
 0x109   :  { %107 = vst.msk [vmem:[%s197_s3] sm:$0xf] %vm106_vm1, %v105_v34 }
 0x10a   :  { %112 = vsyncpa [#allocation3], 1 }
 0x10b   :  { %113 = vsyncpa [#allocation5], 1 }

</bundles_post_ra>
